<compile_context>
chip_gen: v7x
topology: tpu7x:2x2x1
jax: 0.10.0
libtpu: 0.0.40
codegen_flags: <defaults>
</compile_context>

<pallas_src>
import math

import jax
import jax.numpy as jnp
from jax.experimental import pallas as pl
from jax.experimental.pallas import tpu as pltpu


def _unsqueeze_shape(shape, dim):
    """Replicates torch.unsqueeze dim semantics (dim in [-(n+1), n])."""
    ndim = len(shape)
    if not (-(ndim + 1) <= dim <= ndim):
        raise ValueError(f"dim {dim} out of range for rank {ndim}")
    if dim < 0:
        dim = dim + ndim + 1
    return tuple(shape[:dim]) + (1,) + tuple(shape[dim:])


def _hbm_copy_kernel(x_hbm, o_hbm, sem):
    # One whole-array HBM -> HBM DMA: skips HBM->VMEM->vreg->VMEM->HBM staging
    # entirely and removes all pipelining / block-size concerns.
    cp = pltpu.make_async_copy(x_hbm, o_hbm, sem)
    cp.start()
    cp.wait()


def unsqueeze_pallas(x: jax.Array, dim: int) -> jax.Array:
    out_shape = _unsqueeze_shape(x.shape, dim)

    total = math.prod(x.shape) if x.shape else 1
    if total == 0:
        # Nothing to move; pure metadata reshape.
        return jnp.reshape(x, out_shape)

    # Present the data as a simple contiguous slab for the DMA. Lane-dense
    # (rows, 128) when possible; plain 1D otherwise. Both reshapes are free
    # metadata ops fused by XLA.
    if total % 128 == 0:
        view_shape = (total // 128, 128)
    else:
        view_shape = (total,)
    x_view = jnp.reshape(x, view_shape)

    itemsize = jnp.dtype(x.dtype).itemsize
    y_view = pl.pallas_call(
        _hbm_copy_kernel,
        out_shape=jax.ShapeDtypeStruct(view_shape, x.dtype),
        in_specs=[pl.BlockSpec(memory_space=pl.ANY)],
        out_specs=pl.BlockSpec(memory_space=pl.ANY),
        scratch_shapes=[pltpu.SemaphoreType.DMA],
        cost_estimate=pl.CostEstimate(
            flops=0,
            transcendentals=0,
            bytes_accessed=2 * total * itemsize,
        ),
    )(x_view)

    # The actual "unsqueeze" is a free metadata reshape in the wrapper.
    return jnp.reshape(y_view, out_shape)


if __name__ == "__main__":
    key = jax.random.PRNGKey(0)
    x = jax.random.normal(key, (2, 4, 16, 16), dtype=jnp.float32)

    dim = 1  # UnsqueezeModel(dim=1)
    out = unsqueeze_pallas(x, dim)
    jax.block_until_ready(out)

    # Correctness check against the pure-JAX reference (== torch.unsqueeze).
    ref = jnp.expand_dims(x, dim)
    assert out.shape == (2, 1, 4, 16, 16), out.shape
    assert out.dtype == x.dtype
    assert jnp.array_equal(out, ref)

    # Negative dim (torch allows dim == -1 -> trailing axis).
    out_neg = unsqueeze_pallas(x, -1)
    jax.block_until_ready(out_neg)
    assert out_neg.shape == (2, 4, 16, 16, 1), out_neg.shape
    assert jnp.array_equal(out_neg, jnp.expand_dims(x, -1))

    # Non-multiple-of-128 element count: exercises the fixed fallback
    # (flat 1D whole-buffer DMA, no masked-store / VMEM-overflow path).
    x_odd = jax.random.normal(jax.random.PRNGKey(1), (3, 5, 7), dtype=jnp.float32)
    out_odd = unsqueeze_pallas(x_odd, 0)
    jax.block_until_ready(out_odd)
    assert out_odd.shape == (1, 3, 5, 7), out_odd.shape
    assert jnp.array_equal(out_odd, jnp.expand_dims(x_odd, 0))

    print("KERNEL_OK")
</pallas_src>

<mosaic_0001>
module attributes {stable_mosaic.version = 11 : i64} {
  func.func @_hbm_copy_kernel(%arg0: memref<16x128xf32, #tpu.memory_space<any>>, %arg1: memref<16x128xf32, #tpu.memory_space<any>>, %arg2: memref<!tpu.dma_semaphore, #tpu.memory_space<semaphore_mem>>) attributes {dimension_semantics = [], scalar_prefetch = 0 : i64, scratch_operands = 1 : i64, tpu.core_type = #tpu.core_type<tc>} {
    tpu.enqueue_dma source(%arg0 : memref<16x128xf32, #tpu.memory_space<any>>) target(%arg1 : memref<16x128xf32, #tpu.memory_space<any>>) target_semaphore(%arg2 : memref<!tpu.dma_semaphore, #tpu.memory_space<semaphore_mem>>)
    tpu.wait_dma2 semaphore(%arg2 : memref<!tpu.dma_semaphore, #tpu.memory_space<semaphore_mem>>) src(%arg0 : memref<16x128xf32, #tpu.memory_space<any>>) dst(%arg1 : memref<16x128xf32, #tpu.memory_space<any>>)
    return
  }
}

</mosaic_0001>

<bundles_post_ra>
// kernel: tpu_custom_call.1
= control target key start
LH: loop header
LB: loop body
LE: loop exit
PB: predicated region body
PF: predicated region fallthrough
CT: control target
= control target key end

     0   :  { %s34_s6 = smov [#allocation2]   ;;  %s35_s7 = smov [#allocation3]   ;;  %s53_s0 = inlined_call_operand.hbm [shape: f32[16,128], index: 0, kind: input, shape index: {}]   ;;  %s54_s1 = inlined_call_operand.hbm [shape: f32[16,128], index: 1, kind: output, shape index: {}]  }
   0x1   :  { %s36_s8 = smov 0  }
   0x2   :  { %18 = dma.general %s53_s0, 256, %s54_s1, %s34_s6, %s35_s7, [#allocation4], %s36_s8, 0  }
   0x3   :  { %32 = dma.done.wait [#allocation2], 256 }
   0x4   :  { %33 = vsyncadd [#allocation2], 4294967040 }
   0x5   :  { %22 = vsyncmov [#allocation2] }
   0x8   :  { %s23_s13 = vpop.sfrf %22 }
   0x9   :  { %p28_p0 = scmp.ne.s32.totalorder %s23_s13, 0 }
   0xb   :  { %27 = shalt.err (%p28_p0)  }

</bundles_post_ra>
